<compile_context>
chip_gen: v7x
topology: tpu7x:2x2x1
jax: 0.10.0
libtpu: 0.0.40
codegen_flags: <defaults>
</compile_context>

<pallas_src>
import math
import functools

import numpy as np
import jax
import jax.numpy as jnp
from jax.experimental import pallas as pl
from jax.experimental.pallas import tpu as pltpu


def _round_up(n, m):
    return ((n + m - 1) // m) * m


# ----------------------------------------------------------------------------
# Static network configuration (python ints only -- never traced).
# ----------------------------------------------------------------------------
def build_config(transition_dim, dim, dim_mults, kernel_size, output_dim):
    num_channels = [dim * m for m in dim_mults]
    layers = []
    cin = transition_dim
    for i, cout in enumerate(num_channels):
        d = 2 ** (i // 2)
        layers.append(dict(
            dilation=d, cin=cin, cout=cout,
            cin_p=_round_up(cin, 8), cout_p=_round_up(cout, 8),
            has_down=(cin != cout)))
        cin = cout
    shifts = sorted({(kernel_size - 1 - k) * l["dilation"]
                     for l in layers for k in range(kernel_size)} - {0})
    return dict(K=kernel_size, dim=dim, layers=layers, shifts=shifts,
                in_dim=transition_dim, in_dim_p=_round_up(transition_dim, 8),
                out_dim=output_dim, out_dim_p=_round_up(output_dim, 8),
                last_p=layers[-1]["cout_p"])


# ----------------------------------------------------------------------------
# The single fused Pallas kernel: whole TemporalConvNet stack.
# ----------------------------------------------------------------------------
def tcn_kernel(*refs, cfg):
    """Fully fused TCN forward.

    Activation layout: (C_pad, BL_pad) fp32 -- channels on sublanes, batch
    folded into the (128-padded) lane axis.  A causal dilated conv tap is
    W_k @ (roll(x, s) * mask_s): pltpu.roll (same semantics as jnp.roll, i.e.
    result[j] = x[j-s]) runs on the XLU, and mask_s is a per-column 0/1 vector
    that zeroes the first `s` (causal-pad) positions of every batch segment
    and kills any wrap-around leakage.  Every heavy op is thus a small MXU dot
    plus VPU adds/relus; all intermediates stay in VMEM/vregs.
    """
    K = cfg["K"]
    o_ref = refs[-1]
    it = iter(refs[:-1])
    x = next(it)[...]                                    # (Cin_p, BL_pad)
    masks = {s: next(it)[...] for s in cfg["shifts"]}    # each (1, BL_pad)

    def shifted(h, s):
        if s == 0:
            return h
        # Right-shift by s inside each batch segment with causal zero fill.
        return pltpu.roll(h, s, axis=1) * masks[s]

    def causal_conv(h, w_ref, bias, dilation):
        acc = bias                                       # (Cout_p, 1)
        for k in range(K):                               # static unroll (K = 2)
            s = (K - 1 - k) * dilation
            acc = acc + jnp.dot(w_ref[k], shifted(h, s),
                                preferred_element_type=jnp.float32)
        return acc

    for layer in cfg["layers"]:
        d = layer["dilation"]
        w1 = next(it); b1 = next(it)[...]; tb = next(it)[...]
        w2 = next(it); b2 = next(it)[...]
        # out = relu(conv1(x) + b1) + time_bias ; out = relu(conv2(out) + b2)
        h = jnp.maximum(causal_conv(x, w1, b1, d), 0.0) + tb
        h = jnp.maximum(causal_conv(h, w2, b2, d), 0.0)
        if layer["has_down"]:
            wd = next(it)[...]; bd = next(it)[...]
            res = jnp.dot(wd, x, preferred_element_type=jnp.float32) + bd
        else:
            res = x
        x = jnp.maximum(h + res, 0.0)                    # relu(out + res)

    wf = next(it)[...]; bf = next(it)[...]               # final 1x1 conv
    y = jnp.dot(wf, x, preferred_element_type=jnp.float32) + bf
    o_ref[...] = y.astype(o_ref.dtype)


def make_shift_mask(s, B, L, BLp):
    """Column mask for shift s: 1.0 where the shifted value is valid
    (within-segment position >= s and column is a real, non-pad column)."""
    j = np.arange(BLp)
    valid = ((j % L) >= s) & (j < B * L)
    return jnp.asarray(valid, dtype=jnp.float32).reshape(1, BLp)


# ----------------------------------------------------------------------------
# Plain-JAX glue: time-embedding MLP, parameter construction, wrapper.
# ----------------------------------------------------------------------------
def mish(x):
    return x * jnp.tanh(jax.nn.softplus(x))


def sinusoidal_pos_emb(t, dim):
    half = dim // 2
    scale = math.log(10000.0) / (half - 1)
    freqs = jnp.exp(jnp.arange(half, dtype=jnp.float32) * -scale)
    emb = t[:, None].astype(jnp.float32) * freqs[None, :]
    return jnp.concatenate([jnp.sin(emb), jnp.cos(emb)], axis=-1)      # (B, dim)


def init_params(key, cfg):
    dim, K = cfg["dim"], cfg["K"]
    keys = iter(jax.random.split(key, 64))

    def nrm(shape, std):
        return std * jax.random.normal(next(keys), shape, jnp.float32)

    def pad_bias(b, rows):
        return jnp.pad(b, (0, rows - b.shape[0])).reshape(rows, 1)

    p = {
        # TemporalConvNet.time_mlp: Linear(dim,4dim) -> Mish -> Linear(4dim,dim)
        "time_w1": nrm((dim, 4 * dim), 0.1), "time_b1": nrm((4 * dim,), 0.01),
        "time_w2": nrm((4 * dim, dim), 0.1), "time_b2": nrm((dim,), 0.01),
        "layers": [],
    }
    for layer in cfg["layers"]:
        cin, cout = layer["cin"], layer["cout"]
        cin_p, cout_p = layer["cin_p"], layer["cout_p"]
        lp = {
            # Stored (K, Cout, Cin): equals torch Conv1d weight (Cout,Cin,K)
            # transposed (2,0,1) -- NO tap reversal (torch conv = correlation).
            "w1": jnp.pad(nrm((K, cout, cin), 0.1),
                          ((0, 0), (0, cout_p - cout), (0, cin_p - cin))),
            "b1": pad_bias(nrm((cout,), 0.05), cout_p),
            "w2": jnp.pad(nrm((K, cout, cout), 0.1),
                          ((0, 0), (0, cout_p - cout), (0, cout_p - cout))),
            "b2": pad_bias(nrm((cout,), 0.05), cout_p),
            # TemporalBlock.time_mlp: Mish -> Linear(embed_dim, cout)
            "tmlp_w": jnp.pad(nrm((dim, cout), 0.1), ((0, 0), (0, cout_p - cout))),
            "tmlp_b": jnp.pad(nrm((cout,), 0.01), (0, cout_p - cout)),
        }
        if layer["has_down"]:
            lp["down_w"] = jnp.pad(nrm((cout, cin), 0.1),
                                   ((0, cout_p - cout), (0, cin_p - cin)))
            lp["down_b"] = pad_bias(nrm((cout,), 0.05), cout_p)
        p["layers"].append(lp)
    c_last = cfg["layers"][-1]["cout"]
    p["final_w"] = jnp.pad(nrm((cfg["out_dim"], c_last), 0.1),
                           ((0, cfg["out_dim_p"] - cfg["out_dim"]),
                            (0, cfg["last_p"] - c_last)))
    p["final_b"] = pad_bias(nrm((cfg["out_dim"],), 0.01), cfg["out_dim_p"])
    return p


def temporal_conv_net_forward(params, x, cond, time, *, cfg):
    """x: (B, horizon, transition_dim) -> (B, horizon, output_dim)."""
    del cond                                  # unused by the reference forward
    B, L, T = x.shape
    BL = B * L
    BLp = _round_up(BL, 128)                  # lane-dense (unmasked) stores

    # Time embedding MLP (tiny, plain JAX).
    t = sinusoidal_pos_emb(time, cfg["dim"])
    t = mish(t @ params["time_w1"] + params["time_b1"])
    t = t @ params["time_w2"] + params["time_b2"]                     # (B, dim)
    mt = mish(t)

    # Kernel activation layout: (C_pad, BL_pad) -- channels on sublanes,
    # batch folded into lanes padded to a multiple of 128.
    xc = jnp.transpose(x, (2, 0, 1)).reshape(T, BL)
    xc = jnp.pad(xc, ((0, cfg["in_dim_p"] - T), (0, BLp - BL)))

    inputs = [xc]
    inputs += [make_shift_mask(s, B, L, BLp) for s in cfg["shifts"]]
    for layer, lp in zip(cfg["layers"], params["layers"]):
        cout_p = layer["cout_p"]
        tb = mt @ lp["tmlp_w"] + lp["tmlp_b"]                         # (B, Cout_p)
        tb = jnp.broadcast_to(tb.T[:, :, None], (cout_p, B, L)).reshape(cout_p, BL)
        tb = jnp.pad(tb, ((0, 0), (0, BLp - BL)))
        inputs += [lp["w1"], lp["b1"], tb, lp["w2"], lp["b2"]]
        if layer["has_down"]:
            inputs += [lp["down_w"], lp["down_b"]]
    inputs += [params["final_w"], params["final_b"]]

    out = pl.pallas_call(
        functools.partial(tcn_kernel, cfg=cfg),
        out_shape=jax.ShapeDtypeStruct((cfg["out_dim_p"], BLp), jnp.float32),
        in_specs=[pl.BlockSpec(memory_space=pltpu.MemorySpace.VMEM)] * len(inputs),
        out_specs=pl.BlockSpec(memory_space=pltpu.MemorySpace.VMEM),
    )(*inputs)

    out = out[:cfg["out_dim"], :BL].reshape(cfg["out_dim"], B, L)
    return jnp.transpose(out, (1, 2, 0))                              # (B, L, out)


# ----------------------------------------------------------------------------
# Independent pure-JAX reference (pad + chomp causal conv) for a cross-check.
# ----------------------------------------------------------------------------
def reference_forward(params, x, cond, time, *, cfg):
    del cond
    B, L, T = x.shape
    K = cfg["K"]
    t = sinusoidal_pos_emb(time, cfg["dim"])
    t = mish(t @ params["time_w1"] + params["time_b1"])
    t = t @ params["time_w2"] + params["time_b2"]
    mt = mish(t)

    def conv(a, w, b, d):            # a: (C,B,L), w: (K,Cout,C), b: (Cout,1)
        out = b[:, :, None]
        for k in range(K):
            s = (K - 1 - k) * d
            ak = a if s == 0 else jnp.pad(a, ((0, 0), (0, 0), (s, 0)))[:, :, :L]
            out = out + jnp.einsum("oc,cbl->obl", w[k], ak)
        return out

    h = jnp.transpose(x, (2, 0, 1))
    h = jnp.pad(h, ((0, cfg["in_dim_p"] - T), (0, 0), (0, 0)))
    for layer, lp in zip(cfg["layers"], params["layers"]):
        d = layer["dilation"]
        tb = (mt @ lp["tmlp_w"] + lp["tmlp_b"]).T[:, :, None]
        o1 = jax.nn.relu(conv(h, lp["w1"], lp["b1"], d)) + tb
        o2 = jax.nn.relu(conv(o1, lp["w2"], lp["b2"], d))
        if layer["has_down"]:
            res = jnp.einsum("oc,cbl->obl", lp["down_w"], h) + lp["down_b"][:, :, None]
        else:
            res = h
        h = jax.nn.relu(o2 + res)
    y = jnp.einsum("oc,cbl->obl", params["final_w"], h) + params["final_b"][:, :, None]
    return jnp.transpose(y[:cfg["out_dim"]], (1, 2, 0))


if __name__ == "__main__":
    batch, horizon = 2, 16
    transition_dim, cond_dim = 4, 3
    dim, dim_mults = 8, (1, 2, 2, 1)
    kernel_size = 2
    output_dim = transition_dim

    cfg = build_config(transition_dim, dim, dim_mults, kernel_size, output_dim)

    key = jax.random.PRNGKey(0)
    kx, kp = jax.random.split(key, 2)
    x = jax.random.normal(kx, (batch, horizon, transition_dim), jnp.float32)
    cond = jnp.zeros((batch, cond_dim), jnp.float32)
    time = jnp.arange(batch, dtype=jnp.float32) + 1.0

    params = init_params(kp, cfg)

    fwd = jax.jit(functools.partial(temporal_conv_net_forward, cfg=cfg))
    out = fwd(params, x, cond, time)
    jax.block_until_ready(out)
    assert out.shape == (batch, horizon, output_dim)

    ref = reference_forward(params, x, cond, time, cfg=cfg)
    err = float(jnp.max(jnp.abs(out - ref)))
    assert jnp.allclose(out, ref, atol=1e-4, rtol=1e-4), f"max abs err {err}"
    print("KERNEL_OK")
</pallas_src>

<mosaic_0001>
module attributes {stable_mosaic.version = 11 : i64} {
  func.func @tcn_kernel(%arg0: memref<8x128xf32, #tpu.memory_space<vmem>>, %arg1: memref<1x128xf32, #tpu.memory_space<vmem>>, %arg2: memref<1x128xf32, #tpu.memory_space<vmem>>, %arg3: memref<2x8x8xf32, #tpu.memory_space<vmem>>, %arg4: memref<8x1xf32, #tpu.memory_space<vmem>>, %arg5: memref<8x128xf32, #tpu.memory_space<vmem>>, %arg6: memref<2x8x8xf32, #tpu.memory_space<vmem>>, %arg7: memref<8x1xf32, #tpu.memory_space<vmem>>, %arg8: memref<8x8xf32, #tpu.memory_space<vmem>>, %arg9: memref<8x1xf32, #tpu.memory_space<vmem>>, %arg10: memref<2x16x8xf32, #tpu.memory_space<vmem>>, %arg11: memref<16x1xf32, #tpu.memory_space<vmem>>, %arg12: memref<16x128xf32, #tpu.memory_space<vmem>>, %arg13: memref<2x16x16xf32, #tpu.memory_space<vmem>>, %arg14: memref<16x1xf32, #tpu.memory_space<vmem>>, %arg15: memref<16x8xf32, #tpu.memory_space<vmem>>, %arg16: memref<16x1xf32, #tpu.memory_space<vmem>>, %arg17: memref<2x16x16xf32, #tpu.memory_space<vmem>>, %arg18: memref<16x1xf32, #tpu.memory_space<vmem>>, %arg19: memref<16x128xf32, #tpu.memory_space<vmem>>, %arg20: memref<2x16x16xf32, #tpu.memory_space<vmem>>, %arg21: memref<16x1xf32, #tpu.memory_space<vmem>>, %arg22: memref<2x8x16xf32, #tpu.memory_space<vmem>>, %arg23: memref<8x1xf32, #tpu.memory_space<vmem>>, %arg24: memref<8x128xf32, #tpu.memory_space<vmem>>, %arg25: memref<2x8x8xf32, #tpu.memory_space<vmem>>, %arg26: memref<8x1xf32, #tpu.memory_space<vmem>>, %arg27: memref<8x16xf32, #tpu.memory_space<vmem>>, %arg28: memref<8x1xf32, #tpu.memory_space<vmem>>, %arg29: memref<8x8xf32, #tpu.memory_space<vmem>>, %arg30: memref<8x1xf32, #tpu.memory_space<vmem>>, %arg31: memref<8x128xf32, #tpu.memory_space<vmem>>) attributes {dimension_semantics = [], scalar_prefetch = 0 : i64, scratch_operands = 0 : i64, tpu.core_type = #tpu.core_type<tc>} {
    %c0 = arith.constant 0 : index
    %c0_0 = arith.constant 0 : index
    %0 = vector.load %arg0[%c0, %c0_0] : memref<8x128xf32, #tpu.memory_space<vmem>>, vector<8x128xf32>
    %c0_1 = arith.constant 0 : index
    %c0_2 = arith.constant 0 : index
    %1 = vector.load %arg1[%c0_1, %c0_2] : memref<1x128xf32, #tpu.memory_space<vmem>>, vector<1x128xf32>
    %c0_3 = arith.constant 0 : index
    %c0_4 = arith.constant 0 : index
    %2 = vector.load %arg2[%c0_3, %c0_4] : memref<1x128xf32, #tpu.memory_space<vmem>>, vector<1x128xf32>
    %c0_5 = arith.constant 0 : index
    %c0_6 = arith.constant 0 : index
    %3 = vector.load %arg4[%c0_5, %c0_6] : memref<8x1xf32, #tpu.memory_space<vmem>>, vector<8x1xf32>
    %c0_7 = arith.constant 0 : index
    %c0_8 = arith.constant 0 : index
    %4 = vector.load %arg5[%c0_7, %c0_8] : memref<8x128xf32, #tpu.memory_space<vmem>>, vector<8x128xf32>
    %c0_9 = arith.constant 0 : index
    %c0_10 = arith.constant 0 : index
    %5 = vector.load %arg7[%c0_9, %c0_10] : memref<8x1xf32, #tpu.memory_space<vmem>>, vector<8x1xf32>
    %c0_11 = arith.constant 0 : index
    %c0_12 = arith.constant 0 : index
    %c0_13 = arith.constant 0 : index
    %6 = vector.load %arg3[%c0_11, %c0_12, %c0_13] : memref<2x8x8xf32, #tpu.memory_space<vmem>>, vector<1x8x8xf32>
    %7 = vector.shape_cast %6 : vector<1x8x8xf32> to vector<8x8xf32>
    %c1_i32 = arith.constant 1 : i32
    %8 = tpu.dynamic_rotate %0 by %c1_i32 dim 1 : vector<8x128xf32>, i32 -> vector<8x128xf32>
    %9 = vector.broadcast %1 : vector<1x128xf32> to vector<8x128xf32>
    %10 = arith.mulf %8, %9 : vector<8x128xf32>
    %cst = arith.constant dense<0.000000e+00> : vector<8x128xf32>
    %11 = tpu.matmul %7, %10, %cst {dimension_numbers = #tpu.dot_dimension_numbers<[1], [0], [0], [1], [0, 0, 1, 1], [], []>} : vector<8x8xf32>, vector<8x128xf32>, vector<8x128xf32> -> vector<8x128xf32>
    %12 = vector.broadcast %3 : vector<8x1xf32> to vector<8x128xf32>
    %13 = arith.addf %12, %11 : vector<8x128xf32>
    %c1 = arith.constant 1 : index
    %c0_14 = arith.constant 0 : index
    %c0_15 = arith.constant 0 : index
    %14 = vector.load %arg3[%c1, %c0_14, %c0_15] : memref<2x8x8xf32, #tpu.memory_space<vmem>>, vector<1x8x8xf32>
    %15 = vector.shape_cast %14 : vector<1x8x8xf32> to vector<8x8xf32>
    %cst_16 = arith.constant dense<0.000000e+00> : vector<8x128xf32>
    %16 = tpu.matmul %15, %0, %cst_16 {dimension_numbers = #tpu.dot_dimension_numbers<[1], [0], [0], [1], [0, 0, 1, 1], [], []>} : vector<8x8xf32>, vector<8x128xf32>, vector<8x128xf32> -> vector<8x128xf32>
    %17 = arith.addf %13, %16 : vector<8x128xf32>
    %cst_17 = arith.constant 0.000000e+00 : f32
    %18 = vector.broadcast %cst_17 : f32 to vector<8x128xf32>
    %19 = arith.maximumf %17, %18 : vector<8x128xf32>
    %20 = arith.addf %19, %4 : vector<8x128xf32>
    %c0_18 = arith.constant 0 : index
    %c0_19 = arith.constant 0 : index
    %c0_20 = arith.constant 0 : index
    %21 = vector.load %arg6[%c0_18, %c0_19, %c0_20] : memref<2x8x8xf32, #tpu.memory_space<vmem>>, vector<1x8x8xf32>
    %22 = vector.shape_cast %21 : vector<1x8x8xf32> to vector<8x8xf32>
    %c1_i32_21 = arith.constant 1 : i32
    %23 = tpu.dynamic_rotate %20 by %c1_i32_21 dim 1 : vector<8x128xf32>, i32 -> vector<8x128xf32>
    %24 = vector.broadcast %1 : vector<1x128xf32> to vector<8x128xf32>
    %25 = arith.mulf %23, %24 : vector<8x128xf32>
    %cst_22 = arith.constant dense<0.000000e+00> : vector<8x128xf32>
    %26 = tpu.matmul %22, %25, %cst_22 {dimension_numbers = #tpu.dot_dimension_numbers<[1], [0], [0], [1], [0, 0, 1, 1], [], []>} : vector<8x8xf32>, vector<8x128xf32>, vector<8x128xf32> -> vector<8x128xf32>
    %27 = vector.broadcast %5 : vector<8x1xf32> to vector<8x128xf32>
    %28 = arith.addf %27, %26 : vector<8x128xf32>
    %c1_23 = arith.constant 1 : index
    %c0_24 = arith.constant 0 : index
    %c0_25 = arith.constant 0 : index
    %29 = vector.load %arg6[%c1_23, %c0_24, %c0_25] : memref<2x8x8xf32, #tpu.memory_space<vmem>>, vector<1x8x8xf32>
    %30 = vector.shape_cast %29 : vector<1x8x8xf32> to vector<8x8xf32>
    %cst_26 = arith.constant dense<0.000000e+00> : vector<8x128xf32>
    %31 = tpu.matmul %30, %20, %cst_26 {dimension_numbers = #tpu.dot_dimension_numbers<[1], [0], [0], [1], [0, 0, 1, 1], [], []>} : vector<8x8xf32>, vector<8x128xf32>, vector<8x128xf32> -> vector<8x128xf32>
    %32 = arith.addf %28, %31 : vector<8x128xf32>
    %cst_27 = arith.constant 0.000000e+00 : f32
    %33 = vector.broadcast %cst_27 : f32 to vector<8x128xf32>
    %34 = arith.maximumf %32, %33 : vector<8x128xf32>
    %c0_28 = arith.constant 0 : index
    %c0_29 = arith.constant 0 : index
    %35 = vector.load %arg8[%c0_28, %c0_29] : memref<8x8xf32, #tpu.memory_space<vmem>>, vector<8x8xf32>
    %c0_30 = arith.constant 0 : index
    %c0_31 = arith.constant 0 : index
    %36 = vector.load %arg9[%c0_30, %c0_31] : memref<8x1xf32, #tpu.memory_space<vmem>>, vector<8x1xf32>
    %cst_32 = arith.constant dense<0.000000e+00> : vector<8x128xf32>
    %37 = tpu.matmul %35, %0, %cst_32 {dimension_numbers = #tpu.dot_dimension_numbers<[1], [0], [0], [1], [0, 0, 1, 1], [], []>} : vector<8x8xf32>, vector<8x128xf32>, vector<8x128xf32> -> vector<8x128xf32>
    %38 = vector.broadcast %36 : vector<8x1xf32> to vector<8x128xf32>
    %39 = arith.addf %37, %38 : vector<8x128xf32>
    %40 = arith.addf %34, %39 : vector<8x128xf32>
    %cst_33 = arith.constant 0.000000e+00 : f32
    %41 = vector.broadcast %cst_33 : f32 to vector<8x128xf32>
    %42 = arith.maximumf %40, %41 : vector<8x128xf32>
    %c0_34 = arith.constant 0 : index
    %c0_35 = arith.constant 0 : index
    %43 = vector.load %arg11[%c0_34, %c0_35] : memref<16x1xf32, #tpu.memory_space<vmem>>, vector<16x1xf32>
    %c0_36 = arith.constant 0 : index
    %c0_37 = arith.constant 0 : index
    %44 = vector.load %arg12[%c0_36, %c0_37] : memref<16x128xf32, #tpu.memory_space<vmem>>, vector<16x128xf32>
    %c0_38 = arith.constant 0 : index
    %c0_39 = arith.constant 0 : index
    %45 = vector.load %arg14[%c0_38, %c0_39] : memref<16x1xf32, #tpu.memory_space<vmem>>, vector<16x1xf32>
    %c0_40 = arith.constant 0 : index
    %c0_41 = arith.constant 0 : index
    %c0_42 = arith.constant 0 : index
    %46 = vector.load %arg10[%c0_40, %c0_41, %c0_42] : memref<2x16x8xf32, #tpu.memory_space<vmem>>, vector<1x16x8xf32>
    %47 = vector.shape_cast %46 : vector<1x16x8xf32> to vector<16x8xf32>
    %c1_i32_43 = arith.constant 1 : i32
    %48 = tpu.dynamic_rotate %42 by %c1_i32_43 dim 1 : vector<8x128xf32>, i32 -> vector<8x128xf32>
    %49 = vector.broadcast %1 : vector<1x128xf32> to vector<8x128xf32>
    %50 = arith.mulf %48, %49 : vector<8x128xf32>
    %cst_44 = arith.constant dense<0.000000e+00> : vector<16x128xf32>
    %51 = tpu.matmul %47, %50, %cst_44 {dimension_numbers = #tpu.dot_dimension_numbers<[1], [0], [0], [1], [0, 0, 1, 1], [], []>} : vector<16x8xf32>, vector<8x128xf32>, vector<16x128xf32> -> vector<16x128xf32>
    %52 = vector.broadcast %43 : vector<16x1xf32> to vector<16x128xf32>
    %53 = arith.addf %52, %51 : vector<16x128xf32>
    %c1_45 = arith.constant 1 : index
    %c0_46 = arith.constant 0 : index
    %c0_47 = arith.constant 0 : index
    %54 = vector.load %arg10[%c1_45, %c0_46, %c0_47] : memref<2x16x8xf32, #tpu.memory_space<vmem>>, vector<1x16x8xf32>
    %55 = vector.shape_cast %54 : vector<1x16x8xf32> to vector<16x8xf32>
    %cst_48 = arith.constant dense<0.000000e+00> : vector<16x128xf32>
    %56 = tpu.matmul %55, %42, %cst_48 {dimension_numbers = #tpu.dot_dimension_numbers<[1], [0], [0], [1], [0, 0, 1, 1], [], []>} : vector<16x8xf32>, vector<8x128xf32>, vector<16x128xf32> -> vector<16x128xf32>
    %57 = arith.addf %53, %56 : vector<16x128xf32>
    %cst_49 = arith.constant 0.000000e+00 : f32
    %58 = vector.broadcast %cst_49 : f32 to vector<16x128xf32>
    %59 = arith.maximumf %57, %58 : vector<16x128xf32>
    %60 = arith.addf %59, %44 : vector<16x128xf32>
    %c0_50 = arith.constant 0 : index
    %c0_51 = arith.constant 0 : index
    %c0_52 = arith.constant 0 : index
    %61 = vector.load %arg13[%c0_50, %c0_51, %c0_52] : memref<2x16x16xf32, #tpu.memory_space<vmem>>, vector<1x16x16xf32>
    %62 = vector.shape_cast %61 : vector<1x16x16xf32> to vector<16x16xf32>
    %c1_i32_53 = arith.constant 1 : i32
    %63 = tpu.dynamic_rotate %60 by %c1_i32_53 dim 1 : vector<16x128xf32>, i32 -> vector<16x128xf32>
    %64 = vector.broadcast %1 : vector<1x128xf32> to vector<16x128xf32>
    %65 = arith.mulf %63, %64 : vector<16x128xf32>
    %cst_54 = arith.constant dense<0.000000e+00> : vector<16x128xf32>
    %66 = tpu.matmul %62, %65, %cst_54 {dimension_numbers = #tpu.dot_dimension_numbers<[1], [0], [0], [1], [0, 0, 1, 1], [], []>} : vector<16x16xf32>, vector<16x128xf32>, vector<16x128xf32> -> vector<16x128xf32>
    %67 = vector.broadcast %45 : vector<16x1xf32> to vector<16x128xf32>
    %68 = arith.addf %67, %66 : vector<16x128xf32>
    %c1_55 = arith.constant 1 : index
    %c0_56 = arith.constant 0 : index
    %c0_57 = arith.constant 0 : index
    %69 = vector.load %arg13[%c1_55, %c0_56, %c0_57] : memref<2x16x16xf32, #tpu.memory_space<vmem>>, vector<1x16x16xf32>
    %70 = vector.shape_cast %69 : vector<1x16x16xf32> to vector<16x16xf32>
    %cst_58 = arith.constant dense<0.000000e+00> : vector<16x128xf32>
    %71 = tpu.matmul %70, %60, %cst_58 {dimension_numbers = #tpu.dot_dimension_numbers<[1], [0], [0], [1], [0, 0, 1, 1], [], []>} : vector<16x16xf32>, vector<16x128xf32>, vector<16x128xf32> -> vector<16x128xf32>
    %72 = arith.addf %68, %71 : vector<16x128xf32>
    %cst_59 = arith.constant 0.000000e+00 : f32
    %73 = vector.broadcast %cst_59 : f32 to vector<16x128xf32>
    %74 = arith.maximumf %72, %73 : vector<16x128xf32>
    %c0_60 = arith.constant 0 : index
    %c0_61 = arith.constant 0 : index
    %75 = vector.load %arg15[%c0_60, %c0_61] : memref<16x8xf32, #tpu.memory_space<vmem>>, vector<16x8xf32>
    %c0_62 = arith.constant 0 : index
    %c0_63 = arith.constant 0 : index
    %76 = vector.load %arg16[%c0_62, %c0_63] : memref<16x1xf32, #tpu.memory_space<vmem>>, vector<16x1xf32>
    %cst_64 = arith.constant dense<0.000000e+00> : vector<16x128xf32>
    %77 = tpu.matmul %75, %42, %cst_64 {dimension_numbers = #tpu.dot_dimension_numbers<[1], [0], [0], [1], [0, 0, 1, 1], [], []>} : vector<16x8xf32>, vector<8x128xf32>, vector<16x128xf32> -> vector<16x128xf32>
    %78 = vector.broadcast %76 : vector<16x1xf32> to vector<16x128xf32>
    %79 = arith.addf %77, %78 : vector<16x128xf32>
    %80 = arith.addf %74, %79 : vector<16x128xf32>
    %cst_65 = arith.constant 0.000000e+00 : f32
    %81 = vector.broadcast %cst_65 : f32 to vector<16x128xf32>
    %82 = arith.maximumf %80, %81 : vector<16x128xf32>
    %c0_66 = arith.constant 0 : index
    %c0_67 = arith.constant 0 : index
    %83 = vector.load %arg18[%c0_66, %c0_67] : memref<16x1xf32, #tpu.memory_space<vmem>>, vector<16x1xf32>
    %c0_68 = arith.constant 0 : index
    %c0_69 = arith.constant 0 : index
    %84 = vector.load %arg19[%c0_68, %c0_69] : memref<16x128xf32, #tpu.memory_space<vmem>>, vector<16x128xf32>
    %c0_70 = arith.constant 0 : index
    %c0_71 = arith.constant 0 : index
    %85 = vector.load %arg21[%c0_70, %c0_71] : memref<16x1xf32, #tpu.memory_space<vmem>>, vector<16x1xf32>
    %c0_72 = arith.constant 0 : index
    %c0_73 = arith.constant 0 : index
    %c0_74 = arith.constant 0 : index
    %86 = vector.load %arg17[%c0_72, %c0_73, %c0_74] : memref<2x16x16xf32, #tpu.memory_space<vmem>>, vector<1x16x16xf32>
    %87 = vector.shape_cast %86 : vector<1x16x16xf32> to vector<16x16xf32>
    %c2_i32 = arith.constant 2 : i32
    %88 = tpu.dynamic_rotate %82 by %c2_i32 dim 1 : vector<16x128xf32>, i32 -> vector<16x128xf32>
    %89 = vector.broadcast %2 : vector<1x128xf32> to vector<16x128xf32>
    %90 = arith.mulf %88, %89 : vector<16x128xf32>
    %cst_75 = arith.constant dense<0.000000e+00> : vector<16x128xf32>
    %91 = tpu.matmul %87, %90, %cst_75 {dimension_numbers = #tpu.dot_dimension_numbers<[1], [0], [0], [1], [0, 0, 1, 1], [], []>} : vector<16x16xf32>, vector<16x128xf32>, vector<16x128xf32> -> vector<16x128xf32>
    %92 = vector.broadcast %83 : vector<16x1xf32> to vector<16x128xf32>
    %93 = arith.addf %92, %91 : vector<16x128xf32>
    %c1_76 = arith.constant 1 : index
    %c0_77 = arith.constant 0 : index
    %c0_78 = arith.constant 0 : index
    %94 = vector.load %arg17[%c1_76, %c0_77, %c0_78] : memref<2x16x16xf32, #tpu.memory_space<vmem>>, vector<1x16x16xf32>
    %95 = vector.shape_cast %94 : vector<1x16x16xf32> to vector<16x16xf32>
    %cst_79 = arith.constant dense<0.000000e+00> : vector<16x128xf32>
    %96 = tpu.matmul %95, %82, %cst_79 {dimension_numbers = #tpu.dot_dimension_numbers<[1], [0], [0], [1], [0, 0, 1, 1], [], []>} : vector<16x16xf32>, vector<16x128xf32>, vector<16x128xf32> -> vector<16x128xf32>
    %97 = arith.addf %93, %96 : vector<16x128xf32>
    %cst_80 = arith.constant 0.000000e+00 : f32
    %98 = vector.broadcast %cst_80 : f32 to vector<16x128xf32>
    %99 = arith.maximumf %97, %98 : vector<16x128xf32>
    %100 = arith.addf %99, %84 : vector<16x128xf32>
    %c0_81 = arith.constant 0 : index
    %c0_82 = arith.constant 0 : index
    %c0_83 = arith.constant 0 : index
    %101 = vector.load %arg20[%c0_81, %c0_82, %c0_83] : memref<2x16x16xf32, #tpu.memory_space<vmem>>, vector<1x16x16xf32>
    %102 = vector.shape_cast %101 : vector<1x16x16xf32> to vector<16x16xf32>
    %c2_i32_84 = arith.constant 2 : i32
    %103 = tpu.dynamic_rotate %100 by %c2_i32_84 dim 1 : vector<16x128xf32>, i32 -> vector<16x128xf32>
    %104 = vector.broadcast %2 : vector<1x128xf32> to vector<16x128xf32>
    %105 = arith.mulf %103, %104 : vector<16x128xf32>
    %cst_85 = arith.constant dense<0.000000e+00> : vector<16x128xf32>
    %106 = tpu.matmul %102, %105, %cst_85 {dimension_numbers = #tpu.dot_dimension_numbers<[1], [0], [0], [1], [0, 0, 1, 1], [], []>} : vector<16x16xf32>, vector<16x128xf32>, vector<16x128xf32> -> vector<16x128xf32>
    %107 = vector.broadcast %85 : vector<16x1xf32> to vector<16x128xf32>
    %108 = arith.addf %107, %106 : vector<16x128xf32>
    %c1_86 = arith.constant 1 : index
    %c0_87 = arith.constant 0 : index
    %c0_88 = arith.constant 0 : index
    %109 = vector.load %arg20[%c1_86, %c0_87, %c0_88] : memref<2x16x16xf32, #tpu.memory_space<vmem>>, vector<1x16x16xf32>
    %110 = vector.shape_cast %109 : vector<1x16x16xf32> to vector<16x16xf32>
    %cst_89 = arith.constant dense<0.000000e+00> : vector<16x128xf32>
    %111 = tpu.matmul %110, %100, %cst_89 {dimension_numbers = #tpu.dot_dimension_numbers<[1], [0], [0], [1], [0, 0, 1, 1], [], []>} : vector<16x16xf32>, vector<16x128xf32>, vector<16x128xf32> -> vector<16x128xf32>
    %112 = arith.addf %108, %111 : vector<16x128xf32>
    %cst_90 = arith.constant 0.000000e+00 : f32
    %113 = vector.broadcast %cst_90 : f32 to vector<16x128xf32>
    %114 = arith.maximumf %112, %113 : vector<16x128xf32>
    %115 = arith.addf %114, %82 : vector<16x128xf32>
    %cst_91 = arith.constant 0.000000e+00 : f32
    %116 = vector.broadcast %cst_91 : f32 to vector<16x128xf32>
    %117 = arith.maximumf %115, %116 : vector<16x128xf32>
    %c0_92 = arith.constant 0 : index
    %c0_93 = arith.constant 0 : index
    %118 = vector.load %arg23[%c0_92, %c0_93] : memref<8x1xf32, #tpu.memory_space<vmem>>, vector<8x1xf32>
    %c0_94 = arith.constant 0 : index
    %c0_95 = arith.constant 0 : index
    %119 = vector.load %arg24[%c0_94, %c0_95] : memref<8x128xf32, #tpu.memory_space<vmem>>, vector<8x128xf32>
    %c0_96 = arith.constant 0 : index
    %c0_97 = arith.constant 0 : index
    %120 = vector.load %arg26[%c0_96, %c0_97] : memref<8x1xf32, #tpu.memory_space<vmem>>, vector<8x1xf32>
    %c0_98 = arith.constant 0 : index
    %c0_99 = arith.constant 0 : index
    %c0_100 = arith.constant 0 : index
    %121 = vector.load %arg22[%c0_98, %c0_99, %c0_100] : memref<2x8x16xf32, #tpu.memory_space<vmem>>, vector<1x8x16xf32>
    %122 = vector.shape_cast %121 : vector<1x8x16xf32> to vector<8x16xf32>
    %c2_i32_101 = arith.constant 2 : i32
    %123 = tpu.dynamic_rotate %117 by %c2_i32_101 dim 1 : vector<16x128xf32>, i32 -> vector<16x128xf32>
    %124 = vector.broadcast %2 : vector<1x128xf32> to vector<16x128xf32>
    %125 = arith.mulf %123, %124 : vector<16x128xf32>
    %cst_102 = arith.constant dense<0.000000e+00> : vector<8x128xf32>
    %126 = tpu.matmul %122, %125, %cst_102 {dimension_numbers = #tpu.dot_dimension_numbers<[1], [0], [0], [1], [0, 0, 1, 1], [], []>} : vector<8x16xf32>, vector<16x128xf32>, vector<8x128xf32> -> vector<8x128xf32>
    %127 = vector.broadcast %118 : vector<8x1xf32> to vector<8x128xf32>
    %128 = arith.addf %127, %126 : vector<8x128xf32>
    %c1_103 = arith.constant 1 : index
    %c0_104 = arith.constant 0 : index
    %c0_105 = arith.constant 0 : index
    %129 = vector.load %arg22[%c1_103, %c0_104, %c0_105] : memref<2x8x16xf32, #tpu.memory_space<vmem>>, vector<1x8x16xf32>
    %130 = vector.shape_cast %129 : vector<1x8x16xf32> to vector<8x16xf32>
    %cst_106 = arith.constant dense<0.000000e+00> : vector<8x128xf32>
    %131 = tpu.matmul %130, %117, %cst_106 {dimension_numbers = #tpu.dot_dimension_numbers<[1], [0], [0], [1], [0, 0, 1, 1], [], []>} : vector<8x16xf32>, vector<16x128xf32>, vector<8x128xf32> -> vector<8x128xf32>
    %132 = arith.addf %128, %131 : vector<8x128xf32>
    %cst_107 = arith.constant 0.000000e+00 : f32
    %133 = vector.broadcast %cst_107 : f32 to vector<8x128xf32>
    %134 = arith.maximumf %132, %133 : vector<8x128xf32>
    %135 = arith.addf %134, %119 : vector<8x128xf32>
    %c0_108 = arith.constant 0 : index
    %c0_109 = arith.constant 0 : index
    %c0_110 = arith.constant 0 : index
    %136 = vector.load %arg25[%c0_108, %c0_109, %c0_110] : memref<2x8x8xf32, #tpu.memory_space<vmem>>, vector<1x8x8xf32>
    %137 = vector.shape_cast %136 : vector<1x8x8xf32> to vector<8x8xf32>
    %c2_i32_111 = arith.constant 2 : i32
    %138 = tpu.dynamic_rotate %135 by %c2_i32_111 dim 1 : vector<8x128xf32>, i32 -> vector<8x128xf32>
    %139 = vector.broadcast %2 : vector<1x128xf32> to vector<8x128xf32>
    %140 = arith.mulf %138, %139 : vector<8x128xf32>
    %cst_112 = arith.constant dense<0.000000e+00> : vector<8x128xf32>
    %141 = tpu.matmul %137, %140, %cst_112 {dimension_numbers = #tpu.dot_dimension_numbers<[1], [0], [0], [1], [0, 0, 1, 1], [], []>} : vector<8x8xf32>, vector<8x128xf32>, vector<8x128xf32> -> vector<8x128xf32>
    %142 = vector.broadcast %120 : vector<8x1xf32> to vector<8x128xf32>
    %143 = arith.addf %142, %141 : vector<8x128xf32>
    %c1_113 = arith.constant 1 : index
    %c0_114 = arith.constant 0 : index
    %c0_115 = arith.constant 0 : index
    %144 = vector.load %arg25[%c1_113, %c0_114, %c0_115] : memref<2x8x8xf32, #tpu.memory_space<vmem>>, vector<1x8x8xf32>
    %145 = vector.shape_cast %144 : vector<1x8x8xf32> to vector<8x8xf32>
    %cst_116 = arith.constant dense<0.000000e+00> : vector<8x128xf32>
    %146 = tpu.matmul %145, %135, %cst_116 {dimension_numbers = #tpu.dot_dimension_numbers<[1], [0], [0], [1], [0, 0, 1, 1], [], []>} : vector<8x8xf32>, vector<8x128xf32>, vector<8x128xf32> -> vector<8x128xf32>
    %147 = arith.addf %143, %146 : vector<8x128xf32>
    %cst_117 = arith.constant 0.000000e+00 : f32
    %148 = vector.broadcast %cst_117 : f32 to vector<8x128xf32>
    %149 = arith.maximumf %147, %148 : vector<8x128xf32>
    %c0_118 = arith.constant 0 : index
    %c0_119 = arith.constant 0 : index
    %150 = vector.load %arg27[%c0_118, %c0_119] : memref<8x16xf32, #tpu.memory_space<vmem>>, vector<8x16xf32>
    %c0_120 = arith.constant 0 : index
    %c0_121 = arith.constant 0 : index
    %151 = vector.load %arg28[%c0_120, %c0_121] : memref<8x1xf32, #tpu.memory_space<vmem>>, vector<8x1xf32>
    %cst_122 = arith.constant dense<0.000000e+00> : vector<8x128xf32>
    %152 = tpu.matmul %150, %117, %cst_122 {dimension_numbers = #tpu.dot_dimension_numbers<[1], [0], [0], [1], [0, 0, 1, 1], [], []>} : vector<8x16xf32>, vector<16x128xf32>, vector<8x128xf32> -> vector<8x128xf32>
    %153 = vector.broadcast %151 : vector<8x1xf32> to vector<8x128xf32>
    %154 = arith.addf %152, %153 : vector<8x128xf32>
    %155 = arith.addf %149, %154 : vector<8x128xf32>
    %cst_123 = arith.constant 0.000000e+00 : f32
    %156 = vector.broadcast %cst_123 : f32 to vector<8x128xf32>
    %157 = arith.maximumf %155, %156 : vector<8x128xf32>
    %c0_124 = arith.constant 0 : index
    %c0_125 = arith.constant 0 : index
    %158 = vector.load %arg29[%c0_124, %c0_125] : memref<8x8xf32, #tpu.memory_space<vmem>>, vector<8x8xf32>
    %c0_126 = arith.constant 0 : index
    %c0_127 = arith.constant 0 : index
    %159 = vector.load %arg30[%c0_126, %c0_127] : memref<8x1xf32, #tpu.memory_space<vmem>>, vector<8x1xf32>
    %cst_128 = arith.constant dense<0.000000e+00> : vector<8x128xf32>
    %160 = tpu.matmul %158, %157, %cst_128 {dimension_numbers = #tpu.dot_dimension_numbers<[1], [0], [0], [1], [0, 0, 1, 1], [], []>} : vector<8x8xf32>, vector<8x128xf32>, vector<8x128xf32> -> vector<8x128xf32>
    %161 = vector.broadcast %159 : vector<8x1xf32> to vector<8x128xf32>
    %162 = arith.addf %160, %161 : vector<8x128xf32>
    %c0_129 = arith.constant 0 : index
    %c0_130 = arith.constant 0 : index
    %163 = vector.load %arg31[%c0_129, %c0_130] : memref<8x128xf32, #tpu.memory_space<vmem>>, vector<8x128xf32>
    tpu.vector_store %arg31[%c0_129, %c0_130], %162 {strides = array<i32>} : memref<8x128xf32, #tpu.memory_space<vmem>>, vector<8x128xf32>,
    return
  }
}

</mosaic_0001>

<bundles_post_ra>
// kernel: temporal_conv_net_forward.1
= control target key start
LH: loop header
LB: loop body
LE: loop exit
PB: predicated region body
PF: predicated region fallthrough
CT: control target
= control target key end

     0   :  { %v2267_v0 = vmov 0.0   ;;  %vm2268_vm0 = vmmov 0   ;;  %v2269_v2 = vmov 0   ;;  %s2270_s6 = smov 4   ;;  %s2271_s10 = smov 1   ;;  %vm146_vm1 = vcmask 64512   ;;  %s2524_s0 = inlined_call_operand.smem [shape: u32[32], index: -1, kind: input, shape index: {}] }
   0x1   :  { %s1_s5 = sld [smem:[%s2524_s0]]   ;;  %2051 = vmatprep.subr.mxu0 %v2267_v0  ;;  %2053 = vmatprep.mubr.msk.f32.mxu0 %vm2268_vm0, %v2267_v0  ;;  %s2272_s14 = smov 3   ;;  %vm748_vm2 = vcmask 130048  }
   0x2   :  { %2061 = vmatprep.subr.mxu1 %v2267_v0  ;;  %2063 = vmatprep.mubr.msk.f32.mxu1 %vm2268_vm0, %v2267_v0  ;;  %s1922_s9 = sld [smem:[%s2524_s0 + %s2270_s6]]   ;;  %s2273_s18 = smov 5  }
   0x3   :  { %2265 = vset.pattern.permute.xlu0 %v2269_v2  ;;  %2266 = vset.pattern.permute.xlu1 %v2269_v2  ;;  %s1919_s13 = sld [smem:[%s2524_s0 + %s2271_s10]]   ;;  %s2274_s22 = smov 8  }
   0x4   :  { %s1921_s17 = sld [smem:[%s2524_s0 + %s2272_s14]]   ;;  %s2275_s26 = smov 7  }
   0x5   :  { %s1923_s21 = sld [smem:[%s2524_s0 + %s2273_s18]]   ;;  %s2276_s30 = smov 9  }
   0x6   :  { %s1926_s25 = sld [smem:[%s2524_s0 + %s2274_s22]]   ;;  %s2277_s4 = smov 11  }
   0x7   :  { %v130_v1 = vld [vmem:[%s1_s5] sm:$0xff]  ;;  %s1925_s29 = sld [smem:[%s2524_s0 + %s2275_s26]]   ;;  %s2278_s8 = smov 6  }
   0x8   :  { %137 = vrot.lane.b32.xlu0 %v130_v1, %s2271_s10  ;;  %v133_v3 = vld [vmem:[%s1922_s9] sm:$0xff]  ;;  %s1927_s3 = sld [smem:[%s2524_s0 + %s2276_s30]]   ;;  %s2286_s11 = smov 18  }
   0x9   :  { %v2327_v4 = vld [vmem:[%s1919_s13] ss:$0 sm:$0xff]  ;;  %s2355_s7 = sld [smem:[%s2524_s0 + %s2277_s4]]   ;;  %s2279_s13 = smov 10  }
   0xa   :  { %v136_v7 = vld [vmem:[%s1921_s17] sm:$0xff]  ;;  %v1952_v8 = vld [vmem:[%s1921_s17 + $0x8] sm:$0xff]  ;;  %s1924_s12 = sld [smem:[%s2524_s0 + %s2278_s8]]   ;;  %s2280_s17 = smov 15  }
   0xb   :  { %v134_v13 = vld [vmem:[%s1923_s21] sm:$0xff]  ;;  %s1928_s16 = sld [smem:[%s2524_s0 + %s2279_s13]]   ;;  %s2281_s21 = smov 12  }
   0xc   :  { %222 = vperm.xlu0 %2265, %v133_v3   ;;  %v464_v14 = vld [vmem:[%s1926_s25] sm:$0xff]  ;;  %s1933_s20 = sld [smem:[%s2524_s0 + %s2280_s17]]   ;;  %s2282_s25 = smov 13  }
   0xd   :  { %v135_v17 = vld [vmem:[%s1925_s29] sm:$0xff]  ;;  %s1930_s24 = sld [smem:[%s2524_s0 + %s2281_s21]]   ;;  %s2283_s29 = smov 14  }
   0xe   :  { %v465_v18 = vld [vmem:[%s1927_s3] sm:$0xff]  ;;  %s2388_s28 = sld [smem:[%s2524_s0 + %s2282_s25]]   ;;  %s2284_s3 = smov 16  }
   0xf   :  { %v546_v19 = vld [vmem:[%s2355_s7] sm:$0xff]  ;;  %v547_v36 = vld [vmem:[%s2355_s7 + $0x8] sm:$0xff]  ;;  %s1932_s2 = sld [smem:[%s2524_s0 + %s2283_s29]]   ;;  %s2287_s15 = smov 2  }
  0x10   :  { %v304_v22 = vld [vmem:[%s1924_s12] sm:$0xff]  ;;  %v1955_v23 = vld [vmem:[%s1924_s12 + $0x8] sm:$0xff]  ;;  %s1934_s6 = sld [smem:[%s2524_s0 + %s2284_s3]]   ;;  %s2288_s19 = smov 19  }
  0x11   :  { %v552_v27 = vld [vmem:[%s1928_s16] sm:$0xff]  ;;  %v553_v39 = vld [vmem:[%s1928_s16 + $0x8] sm:$0xff]  ;;  %v1960_v40 = vld [vmem:[%s1928_s16 + $0x10] sm:$0xff]  ;;  %s1936_s14 = sld [smem:[%s2524_s0 + %s2286_s11]]   ;;  %s2289_s23 = smov 20  }
  0x12   :  { %v1961_v41 = vld [vmem:[%s1928_s16 + $0x18] sm:$0xff]  ;;  %v930_v42 = vld [vmem:[%s1933_s20] sm:$0xff]  ;;  %v931_v43 = vld [vmem:[%s1933_s20 + $0x8] sm:$0xff]  ;;  %s1920_s18 = sld [smem:[%s2524_s0 + %s2287_s15]]   ;;  %s2290_s27 = smov 21  }
  0x13   :  { %v549_v49 = vld [vmem:[%s1930_s24 + $0x8] sm:$0xff]  ;;  %v548_v53 = vld [vmem:[%s1930_s24] sm:$0xff]  ;;  %s1937_s22 = sld [smem:[%s2524_s0 + %s2288_s19]]   ;;  %s2292_s1 = smov 23  }
  0x14   :  { %v740_v51 = vld [vmem:[%s2388_s28] sm:$0xff]  ;;  %s2450_s26 = sld [smem:[%s2524_s0 + %s2289_s23]]   ;;  %s2293_s5 = smov 26  }
  0x15   :  { %v551_v57 = vld [vmem:[%s1932_s2 + $0x8] sm:$0xff]  ;;  %v550_v59 = vld [vmem:[%s1932_s2] sm:$0xff]  ;;  %s1939_s30 = sld [smem:[%s2524_s0 + %s2290_s27]]   ;;  %s2294_s8 = smov 30  }
  0x16   :  { %v933_v61 = vld [vmem:[%s1934_s6 + $0x8] sm:$0xff]  ;;  %v932_v62 = vld [vmem:[%s1934_s6] sm:$0xff]  ;;  %s1941_s4 = sld [smem:[%s2524_s0 + %s2292_s1]]   ;;  %s2295_s13 = smov 22  }
  0x17   :  { %s1944_s7 = sld [smem:[%s2524_s0 + %s2293_s5]]  }
  0x18   :  { %s1948_s12 = sld [smem:[%s2524_s0 + %s2294_s8]]  }
  0x19   :  { %s1940_s17 = sld [smem:[%s2524_s0 + %s2295_s13]]  }
  0x7a   :  { %v138_v5 = vpop.permute.xlu0 %137 }
  0x7b   :  { %v145_v6 = vmul.f32 %v2327_v4, %v138_v5 }
  0x7d   :  { %2052 = vmatpush3.msra.mxu0 %v145_v6 }
  0x7e   :  { %2054 = vmatmul.mubr.msk.f32.vlgmr.msra.gmra.mrb[0].mxu0 %vm146_vm1, %v136_v7  ;;  %2056 = vmatprep.subr.mxu0 %v2267_v0  ;;  %v741_v7 = vld [vmem:[%s2388_s28 + $0x8] sm:$0xff] }
  0x7f   :  { %2057 = vmatpush3.msra.mxu0 %v130_v1  ;;  %2058 = vmatprep.mubr.msk.f32.mxu0 %vm2268_vm0, %v2267_v0 }
  0x80   :  { %2071 = vmatprep.subr.mxu0 %v2267_v0 }
  0x86   :  { %2059 = vmatmul.mubr.msk.f32.vlgmr.msra.gmra.mrb[0].mxu0 %vm146_vm1, %v1952_v8  ;;  %v1966_v8 = vld [vmem:[%s2388_s28 + $0x10] sm:$0xff] }
  0x87   :  { %2072 = vmatpush3.msra.mxu0 %v130_v1  ;;  %2073 = vmatprep.mubr.msk.f32.mxu0 %vm2268_vm0, %v2267_v0 }
  0x8a   :  { %2074 = vmatmul.mubr.msk.f32.vlgmr.msra.gmra.mrb[2].mxu0 %vm146_vm1, %v464_v14 }
  0x8b   :  { %v223_v9 = vpop.permute.xlu0 %222  ;;  %2090 = vmatprep.mubr.msk.f32.mxu0 %vm748_vm2, %v740_v51  ;;  %v1034_v51 = vld [vmem:[%s1939_s30 + $0x8] sm:$0xff] }
 0x159   :  { %v297_v10 = vpop.f32.mrb[0].mxu0 }
 0x15a   :  { %v2202_v11 = vadd.f32 %v297_v10, %v223_v9  ;;  %v2060_v12 = vpop.f32.mrb[1].mxu0  ;;  %v1967_v9 = vld [vmem:[%s2388_s28 + $0x18] sm:$0xff] }
 0x15c   :  { %v302_v15 = vmax.f32 %v2202_v11, 0.0 }
 0x15d   :  { %v540_v24 = vpop.f32.mrb[2].mxu0 }
 0x15e   :  { %v303_v16 = vadd.f32 %v302_v15, %v134_v13  ;;  %v2075_v25 = vpop.f32.mrb[3].mxu0 }
 0x160   :  { %305 = vrot.lane.b32.xlu1 %v303_v16, %s2271_s10 }
 0x164   :  { %383 = vperm.xlu1 %2266, %v135_v17  }
 0x168   :  { %468 = vperm.xlu1 %2266, %v465_v18  }
 0x16c   :  { %640 = vperm.xlu1 %2266, %v546_v19  }
 0x1d2   :  { %v306_v20 = vpop.permute.xlu1 %305 }
 0x1d3   :  { %v307_v21 = vmul.f32 %v2327_v4, %v306_v20 }
 0x1d5   :  { %2062 = vmatpush3.msra.mxu1 %v307_v21 }
 0x1d6   :  { %2064 = vmatmul.mubr.msk.f32.vlgmr.msra.gmra.mrb[0].mxu1 %vm146_vm1, %v304_v22  ;;  %2066 = vmatprep.subr.mxu1 %v2267_v0 }
 0x1d7   :  { %2067 = vmatpush3.msra.mxu1 %v303_v16  ;;  %2068 = vmatprep.mubr.msk.f32.mxu1 %vm2268_vm0, %v2267_v0 }
 0x1de   :  { %2069 = vmatmul.mubr.msk.f32.vlgmr.msra.gmra.mrb[0].mxu1 %vm146_vm1, %v1955_v23 }
 0x1df   :  { %2078 = vmatprep.mubr.msk.f32.mxu1 %vm146_vm1, %v552_v27  ;;  %v1029_v27 = vld [vmem:[%s1936_s14] sm:$0xff] }
 0x1e3   :  { %v384_v26 = vpop.permute.xlu1 %383 }
 0x1e7   :  { %v469_v31 = vpop.permute.xlu1 %468 }
 0x1e8   :  { %v541_v32 = vadd.f32 %v540_v24, %v469_v31 }
 0x1eb   :  { %v641_v46 = vpop.permute.xlu1 %640 }
 0x2b1   :  { %v458_v28 = vpop.f32.mrb[0].mxu1 }
 0x2b2   :  { %v2203_v29 = vadd.f32 %v458_v28, %v384_v26  ;;  %v2070_v30 = vpop.f32.mrb[1].mxu1  ;;  %v1030_v26 = vld [vmem:[%s1936_s14 + $0x8] sm:$0xff]  ;;  %v2430_v28 = vld [vmem:[%s1920_s18] ss:$0 sm:$0xff]  ;;  %s2296_s18 = smov 27  }
 0x2b3   :  { %s1945_s21 = sld [smem:[%s2524_s0 + %s2296_s18]]  }
 0x2b4   :  { %v463_v33 = vmax.f32 %v2203_v29, 0.0 }
 0x2b6   :  { %v544_v34 = vadd.f32 %v541_v32, %v463_v33 }
 0x2b8   :  { %v545_v35 = vmax.f32 %v544_v34, 0.0 }
 0x2ba   :  { %554 = vrot.lane.b32.xlu0 %v545_v35, %s2271_s10 }
 0x2be   :  { %645 = vperm.xlu0 %2265, %v547_v36  }
 0x32c   :  { %v555_v37 = vpop.permute.xlu0 %554 }
 0x32d   :  { %v556_v38 = vmul.f32 %v2327_v4, %v555_v37 }
 0x32f   :  { %2076 = vmatprep.subr.mxu1 %v556_v38 }
 0x330   :  { %2077 = vmatpush3.msra.mxu1 %v556_v38 }
 0x331   :  { %2079 = vmatmul.mubr.msk.f32.vlgmr.msra.gmra.mrb[2].mxu1 %vm146_vm1, %v553_v39  ;;  %2081 = vmatprep.subr.mxu1 %v545_v35 }
 0x332   :  { %2082 = vmatpush3.msra.mxu1 %v545_v35  ;;  %2083 = vmatprep.mubr.msk.f32.mxu1 %vm146_vm1, %v1960_v40 }
 0x333   :  { %2100 = vmatprep.subr.mxu1 %v545_v35 }
 0x339   :  { %2084 = vmatmul.mubr.msk.f32.vlgmr.msra.gmra.mrb[2].mxu1 %vm146_vm1, %v1961_v41 }
 0x33a   :  { %2101 = vmatpush3.msra.mxu1 %v545_v35  ;;  %2102 = vmatprep.mubr.msk.f32.mxu1 %vm146_vm1, %v930_v42 }
 0x33d   :  { %2103 = vmatmul.mubr.msk.f32.vlgmr.msra.gmra.mrb[4].mxu1 %vm146_vm1, %v931_v43  ;;  %v646_v44 = vpop.permute.xlu0 %645  ;;  %v1032_v43 = vld [vmem:[%s1937_s22 + $0x8] sm:$0xff] }
 0x40c   :  { %v2085_v45 = vpop.f32.mrb[2].mxu1 }
 0x40d   :  { %v2204_v47 = vadd.f32 %v2085_v45, %v646_v44  ;;  %v725_v48 = vpop.f32.mrb[3].mxu1  ;;  %v1232_v45 = vld [vmem:[%s2450_s26] sm:$0xff] }
 0x40e   :  { %v2205_v50 = vadd.f32 %v725_v48, %v641_v46  ;;  %2123 = vmatprep.mubr.msk.f32.mxu1 %vm748_vm2, %v1232_v45 }
 0x40f   :  { %v737_v52 = vmax.f32 %v2204_v47, 0.0  ;;  %v1031_v47 = vld [vmem:[%s1937_s22] sm:$0xff]  ;;  %s2297_s22 = smov 24  }
 0x410   :  { %v736_v54 = vmax.f32 %v2205_v50, 0.0  ;;  %v2104_v60 = vpop.f32.mrb[4].mxu1  ;;  %s1942_s25 = sld [smem:[%s2524_s0 + %s2297_s22]]  }
 0x411   :  { %v739_v55 = vadd.f32 %v737_v52, %v549_v49  ;;  %v1016_v63 = vpop.f32.mrb[5].mxu1 }
 0x412   :  { %v738_v56 = vadd.f32 %v736_v54, %v548_v53  ;;  %v1033_v53 = vld [vmem:[%s1939_s30] sm:$0xff]  ;;  %s2299_s30 = smov 25  }
 0x413   :  { %744 = vrot.lane.b32.xlu0 %v739_v55, %s2271_s10  ;;  %s1943_s3 = sld [smem:[%s2524_s0 + %s2299_s30]]  }
 0x414   :  { %742 = vrot.lane.b32.xlu1 %v738_v56, %s2271_s10  ;;  %v2173_v58 = vpack.c.bf16 %v739_v55, %v738_v56  ;;  %s2285_s10 = smov 17  }
 0x415   :  { %s2411_s9 = sld [smem:[%s2524_s0 + %s2285_s10]]   ;;  %s2301_s10 = smov 31  }
 0x417   :  { %837 = vperm.xlu0 %2265, %v551_v57  }
 0x418   :  { %832 = vperm.xlu1 %2266, %v550_v59   ;;  %v1233_v59 = vld [vmem:[%s2450_s26 + $0x8] sm:$0xff] }
 0x41b   :  { %941 = vperm.xlu0 %2265, %v933_v61   ;;  %v1035_v21 = vld [vmem:[%s2411_s9] sm:$0xff]  ;;  %v1036_v35 = vld [vmem:[%s2411_s9 + $0x8] sm:$0xff]  ;;  %v1975_v36 = vld [vmem:[%s2411_s9 + $0x10] sm:$0xff] }
 0x41c   :  { %936 = vperm.xlu1 %2266, %v932_v62   ;;  %v1976_v37 = vld [vmem:[%s2411_s9 + $0x18] sm:$0xff]  ;;  %s1949_s9 = sld [smem:[%s2524_s0 + %s2301_s10]]  }
 0x41d   :  { %v1982_v61 = vld [vmem:[%s2450_s26 + $0x18] sm:$0xff] }
 0x485   :  { %v745_v1 = vpop.permute.xlu0 %744 }
 0x486   :  { %v747_v2 = vmul.f32 %v2327_v4, %v745_v1  ;;  %v743_v3 = vpop.permute.xlu1 %742  ;;  %v2291_v1 = vmov 0.0|0.0  }
 0x487   :  { %v746_v5 = vmul.f32 %v2327_v4, %v743_v3 }
 0x489   :  { %v2169_v6 = vpack.c.bf16 %v747_v2, %v746_v5 }
 0x48b   :  { %2170 = vmatprep.subr.bf16.mxu0 %v2169_v6 }
 0x48c   :  { %2172 = vmatpush3.bf16.msra.mxu0 %v2169_v6 }
 0x48d   :  { %2174 = vmatprep.subr.bf16.mxu0 %v2173_v58 }
 0x48f   :  { %2091 = vmatmul.mubr.msk.f32.vlgmr.msra.gmra.mrb[4].mxu0 %vm748_vm2, %v741_v7 }
 0x490   :  { %2176 = vmatpush3.bf16.msra.mxu0 %v2173_v58  ;;  %2097 = vmatprep.mubr.msk.f32.mxu0 %vm748_vm2, %v1966_v8 }
 0x496   :  { %v838_v10 = vpop.permute.xlu0 %837 }
 0x497   :  { %2098 = vmatmul.mubr.msk.f32.vlgmr.msra.gmra.mrb[4].mxu0 %vm748_vm2, %v1967_v9  ;;  %v833_v11 = vpop.permute.xlu1 %832 }
 0x498   :  { %2109 = vmatprep.mubr.msk.f32.mxu0 %vm748_vm2, %v1035_v21  ;;  %v1428_v21 = vld [vmem:[%s1940_s17] sm:$0xff] }
 0x49a   :  { %v942_v4 = vpop.permute.xlu0 %941 }
 0x49b   :  { %v937_v13 = vpop.permute.xlu1 %936  ;;  %v1022_v17 = vadd.f32 %v2104_v60, %v942_v4  ;;  %v1981_v60 = vld [vmem:[%s2450_s26 + $0x10] sm:$0xff]  ;;  %s2298_s26 = smov 28  }
 0x49c   :  { %v1017_v19 = vadd.f32 %v1016_v63, %v937_v13  ;;  %v1425_v13 = vld [vmem:[%s1941_s4] sm:$0xff]  ;;  %s1946_s29 = sld [smem:[%s2524_s0 + %s2298_s26]]  }
 0x56a   :  { %v2099_v12 = vpop.f32.mrb[4].mxu0 }
 0x56b   :  { %v2206_v14 = vadd.f32 %v2099_v12, %v838_v10  ;;  %v917_v15 = vpop.f32.mrb[5].mxu0 }
 0x56c   :  { %v2207_v16 = vadd.f32 %v917_v15, %v833_v11  ;;  %v1835_v15 = vld [vmem:[%s1948_s12] sm:$0xff] }
 0x56d   :  { %v929_v18 = vmax.f32 %v2206_v14, 0.0  ;;  %v1427_v14 = vld [vmem:[%s1944_s7] sm:$0xff] }
 0x56e   :  { %v928_v20 = vmax.f32 %v2207_v16, 0.0 }
 0x56f   :  { %v1026_v22 = vadd.f32 %v1022_v17, %v929_v18 }
 0x570   :  { %v1025_v23 = vadd.f32 %v1017_v19, %v928_v20 }
 0x571   :  { %v2418_v24 = vmax.f32 %v1026_v22, 0.0  ;;  %v1986_v22 = vld [vmem:[%s1940_s17 + $0x8] sm:$0xff] }
 0x572   :  { %v2420_v25 = vmax.f32 %v1025_v23, 0.0  ;;  %v1752_v23 = vld [vmem:[%s1945_s21] sm:$0xff] }
 0x573   :  { %1039 = vrot.lane.b32.xlu0 %v2418_v24, %s2287_s15 }
 0x574   :  { %1037 = vrot.lane.b32.xlu1 %v2420_v25, %s2287_s15  ;;  %v2181_v34 = vpack.c.bf16 %v2418_v24, %v2420_v25 }
 0x577   :  { %1137 = vperm.xlu0 %2265, %v1030_v26  }
 0x578   :  { %1132 = vperm.xlu1 %2266, %v1029_v27  }
 0x5e5   :  { %v1040_v29 = vpop.permute.xlu0 %1039 }
 0x5e6   :  { %v1048_v30 = vmul.f32 %v2430_v28, %v1040_v29  ;;  %v1038_v31 = vpop.permute.xlu1 %1037  ;;  %v1426_v29 = vld [vmem:[%s1942_s25] sm:$0xff] }
 0x5e7   :  { %v1047_v32 = vmul.f32 %v2430_v28, %v1038_v31 }
 0x5e9   :  { %v2177_v33 = vpack.c.bf16 %v1048_v30, %v1047_v32  ;;  %v1753_v32 = vld [vmem:[%s1946_s29] sm:$0xff] }
 0x5eb   :  { %2178 = vmatprep.subr.bf16.mxu0 %v2177_v33 }
 0x5ec   :  { %2180 = vmatpush3.bf16.msra.mxu0 %v2177_v33 }
 0x5ed   :  { %2182 = vmatprep.subr.bf16.mxu0 %v2181_v34 }
 0x5ef   :  { %2110 = vmatmul.mubr.msk.f32.vlgmr.msra.gmra.mrb[6].mxu0 %vm748_vm2, %v1036_v35 }
 0x5f0   :  { %2184 = vmatpush3.bf16.msra.mxu0 %v2181_v34  ;;  %2116 = vmatprep.mubr.msk.f32.mxu0 %vm748_vm2, %v1975_v36 }
 0x5f1   :  { %2193 = vmatprep.subr.bf16.mxu0 %v2291_v1 }
 0x5f6   :  { %v1138_v38 = vpop.permute.xlu0 %1137 }
 0x5f7   :  { %2117 = vmatmul.mubr.msk.f32.vlgmr.msra.gmra.mrb[6].mxu0 %vm748_vm2, %v1976_v37  ;;  %v1133_v40 = vpop.permute.xlu1 %1132  ;;  %v1592_v37 = vld [vmem:[%s1943_s3] sm:$0xff] }
 0x5f8   :  { %2137 = vmatprep.mubr.msk.f32.mxu0 %vm2268_vm0, %v2267_v0 }
 0x6ca   :  { %v2118_v39 = vpop.f32.mrb[6].mxu0 }
 0x6cb   :  { %v2208_v41 = vadd.f32 %v2118_v39, %v1138_v38  ;;  %v1217_v42 = vpop.f32.mrb[7].mxu0  ;;  %v1989_v38 = vld [vmem:[%s1943_s3 + $0x8] sm:$0xff] }
 0x6cc   :  { %v2209_v44 = vadd.f32 %v1217_v42, %v1133_v40 }
 0x6cd   :  { %v1229_v46 = vmax.f32 %v2208_v41, 0.0 }
 0x6ce   :  { %v1228_v48 = vmax.f32 %v2209_v44, 0.0 }
 0x6cf   :  { %v1231_v49 = vadd.f32 %v1229_v46, %v1032_v43 }
 0x6d0   :  { %v1230_v50 = vadd.f32 %v1228_v48, %v1031_v47 }
 0x6d1   :  { %1236 = vrot.lane.b32.xlu0 %v1231_v49, %s2287_s15 }
 0x6d2   :  { %1234 = vrot.lane.b32.xlu1 %v1230_v50, %s2287_s15  ;;  %v2189_v52 = vpack.c.bf16 %v1231_v49, %v1230_v50 }
 0x6d5   :  { %1328 = vperm.xlu0 %2265, %v1034_v51  }
 0x6d6   :  { %1323 = vperm.xlu1 %2266, %v1033_v53  }
 0x743   :  { %v1237_v54 = vpop.permute.xlu0 %1236 }
 0x744   :  { %v1239_v55 = vmul.f32 %v2430_v28, %v1237_v54  ;;  %v1235_v56 = vpop.permute.xlu1 %1234 }
 0x745   :  { %v1238_v57 = vmul.f32 %v2430_v28, %v1235_v56 }
 0x747   :  { %v2185_v58 = vpack.c.bf16 %v1239_v55, %v1238_v57 }
 0x749   :  { %2186 = vmatprep.subr.bf16.mxu1 %v2185_v58 }
 0x74a   :  { %2188 = vmatpush3.bf16.msra.mxu1 %v2185_v58 }
 0x74b   :  { %2190 = vmatprep.subr.bf16.mxu1 %v2189_v52 }
 0x74d   :  { %2124 = vmatmul.mubr.msk.f32.vlgmr.msra.gmra.mrb[6].mxu1 %vm748_vm2, %v1233_v59 }
 0x74e   :  { %2192 = vmatpush3.bf16.msra.mxu1 %v2189_v52  ;;  %2130 = vmatprep.mubr.msk.f32.mxu1 %vm748_vm2, %v1981_v60 }
 0x74f   :  { %2147 = vmatprep.subr.mxu1 %v2267_v0 }
 0x754   :  { %v1329_v62 = vpop.permute.xlu0 %1328 }
 0x755   :  { %2131 = vmatmul.mubr.msk.f32.vlgmr.msra.gmra.mrb[6].mxu1 %vm748_vm2, %v1982_v61  ;;  %v1324_v2 = vpop.permute.xlu1 %1323 }
 0x756   :  { %2149 = vmatprep.mubr.msk.f32.mxu1 %vm2268_vm0, %v2267_v0 }
 0x828   :  { %v2132_v63 = vpop.f32.mrb[6].mxu1 }
 0x829   :  { %v2210_v3 = vadd.f32 %v2132_v63, %v1329_v62  ;;  %v1408_v5 = vpop.f32.mrb[7].mxu1 }
 0x82a   :  { %v2211_v6 = vadd.f32 %v1408_v5, %v1324_v2 }
 0x82b   :  { %v1420_v7 = vmax.f32 %v2210_v3, 0.0 }
 0x82c   :  { %v1419_v8 = vmax.f32 %v2211_v6, 0.0 }
 0x82d   :  { %v1422_v9 = vadd.f32 %v1420_v7, %v2418_v24 }
 0x82e   :  { %v1421_v10 = vadd.f32 %v1419_v8, %v2420_v25 }
 0x82f   :  { %v1424_v11 = vmax.f32 %v1422_v9, 0.0 }
 0x830   :  { %v1423_v4 = vmax.f32 %v1421_v10, 0.0 }
 0x831   :  { %1431 = vrot.lane.b32.xlu0 %v1424_v11, %s2287_s15 }
 0x832   :  { %v2197_v12 = vpack.c.bf16 %v1424_v11, %v1423_v4  ;;  %1429 = vrot.lane.b32.xlu1 %v1423_v4, %s2287_s15 }
 0x836   :  { %1510 = vperm.xlu1 %2266, %v1425_v13  }
 0x83a   :  { %1671 = vperm.xlu1 %2266, %v1427_v14  }
 0x83e   :  { %1838 = vperm.xlu1 %2266, %v1835_v15  }
 0x8a3   :  { %v1432_v16 = vpop.permute.xlu0 %1431 }
 0x8a4   :  { %v1434_v17 = vmul.f32 %v2430_v28, %v1432_v16  ;;  %v1430_v18 = vpop.permute.xlu1 %1429 }
 0x8a5   :  { %v1433_v19 = vmul.f32 %v2430_v28, %v1430_v18 }
 0x8a7   :  { %v2194_v20 = vpack.c.bf16 %v1434_v17, %v1433_v19 }
 0x8a9   :  { %2195 = vmatpush3.bf16.msra.mxu0 %v2194_v20 }
 0x8aa   :  { %2196 = vmatprep.subr.bf16.mxu0 %v2291_v1 }
 0x8ac   :  { %2138 = vmatmul.mubr.msk.f32.vlgmr.msra.gmra.mrb[8].mxu0 %vm748_vm2, %v1428_v21 }
 0x8ad   :  { %2198 = vmatpush3.bf16.msra.mxu0 %v2197_v12  ;;  %2144 = vmatprep.mubr.msk.f32.mxu0 %vm2268_vm0, %v2267_v0 }
 0x8ae   :  { %2199 = vmatprep.subr.bf16.mxu0 %v2291_v1 }
 0x8b4   :  { %2145 = vmatmul.mubr.msk.f32.vlgmr.msra.gmra.mrb[8].mxu0 %vm748_vm2, %v1986_v22 }
 0x8b5   :  { %2201 = vmatpush3.bf16.msra.mxu0 %v2197_v12  ;;  %2161 = vmatprep.mubr.msk.f32.mxu0 %vm2268_vm0, %v2267_v0  ;;  %v1511_v24 = vpop.permute.xlu1 %1510 }
 0x8b8   :  { %2162 = vmatmul.mubr.msk.f32.vlgmr.msra.gmra.mrb[10].mxu0 %vm748_vm2, %v1752_v23 }
 0x8b9   :  { %v1672_v39 = vpop.permute.xlu1 %1671 }
 0x987   :  { %v1585_v25 = vpop.f32.mrb[8].mxu0 }
 0x988   :  { %v2212_v26 = vadd.f32 %v1585_v25, %v1511_v24  ;;  %v2146_v27 = vpop.f32.mrb[9].mxu0 }
 0x98a   :  { %v1590_v30 = vmax.f32 %v2212_v26, 0.0 }
 0x98b   :  { %v1828_v33 = vpop.f32.mrb[10].mxu0 }
 0x98c   :  { %v1591_v31 = vadd.f32 %v1590_v30, %v1426_v29  ;;  %v2163_v34 = vpop.f32.mrb[11].mxu0 }
 0x98e   :  { %1593 = vrot.lane.b32.xlu0 %v1591_v31, %s2287_s15  ;;  %s2300_s15 = smov 29  }
 0x98f   :  { %s1947_s6 = sld [smem:[%s2524_s0 + %s2300_s15]]  }
 0x992   :  { %1756 = vperm.xlu0 %2265, %v1753_v32  }
 0x995   :  { %v1834_v47 = vld [vmem:[%s1947_s6] sm:$0xff] }
 0xa00   :  { %v1594_v35 = vpop.permute.xlu0 %1593 }
 0xa01   :  { %v1595_v36 = vmul.f32 %v2430_v28, %v1594_v35 }
 0xa03   :  { %2148 = vmatpush3.msra.mxu1 %v1595_v36 }
 0xa04   :  { %2150 = vmatmul.mubr.msk.f32.vlgmr.msra.gmra.mrb[8].mxu1 %vm146_vm1, %v1592_v37  ;;  %2152 = vmatprep.subr.mxu1 %v2267_v0 }
 0xa05   :  { %2153 = vmatpush3.msra.mxu1 %v1591_v31  ;;  %2154 = vmatprep.mubr.msk.f32.mxu1 %vm2268_vm0, %v2267_v0 }
 0xa06   :  { %2164 = vmatprep.subr.mxu1 %v2267_v0 }
 0xa0c   :  { %2155 = vmatmul.mubr.msk.f32.vlgmr.msra.gmra.mrb[8].mxu1 %vm146_vm1, %v1989_v38 }
 0xa0d   :  { %2166 = vmatprep.mubr.msk.f32.mxu1 %vm2268_vm0, %v2267_v0  ;;  %v1839_v0 = vpop.permute.xlu1 %1838 }
 0xa11   :  { %v1757_v28 = vpop.permute.xlu0 %1756 }
 0xa12   :  { %v1829_v43 = vadd.f32 %v1828_v33, %v1757_v28 }
 0xadf   :  { %v1746_v40 = vpop.f32.mrb[8].mxu1 }
 0xae0   :  { %v2213_v41 = vadd.f32 %v1746_v40, %v1672_v39  ;;  %v2156_v42 = vpop.f32.mrb[9].mxu1 }
 0xae2   :  { %v1751_v44 = vmax.f32 %v2213_v41, 0.0 }
 0xae4   :  { %v1832_v45 = vadd.f32 %v1829_v43, %v1751_v44 }
 0xae6   :  { %v1833_v46 = vmax.f32 %v1832_v45, 0.0 }
 0xae8   :  { %2165 = vmatpush3.msra.mxu1 %v1833_v46 }
 0xae9   :  { %2167 = vmatmul.mubr.msk.f32.vlgmr.msra.gmra.mrb[10].mxu1 %vm146_vm1, %v1834_v47 }
 0xbbc   :  { %v1910_v48 = vpop.f32.mrb[10].mxu1 }
 0xbbd   :  { %v1911_v49 = vadd.f32 %v1910_v48, %v1839_v0  ;;  %v2168_v50 = vpop.f32.mrb[11].mxu1 }
 0xbbf   :  { %1914 = vst [vmem:[%s1949_s9] sm:$0xff] %v1911_v49 }

</bundles_post_ra>
